<compile_context>
chip_gen: v6e
topology: v6e:2x2x1
jax: 0.10.0
libtpu: 0.0.40
codegen_flags: <defaults>
</compile_context>

<pallas_src>
import functools

import jax
import jax.numpy as jnp
from jax.experimental import pallas as pl
from jax.experimental.pallas import tpu as pltpu

HIDDEN = 256
LANE = 128
SUBLANE = 8


def _round_up(x, m):
    return ((x + m - 1) // m) * m


def _actor_kernel(s_ref, w_ref, b_ref, o_ref, *, max_action, s_pad, hidden):
    # s_ref : [B_BLK, s_pad]              f32  (zero-padded state)
    # w_ref : [s_pad + 2*hidden, hidden]  bf16 (W1 | W2 | W3, row-stacked)
    # b_ref : [8, hidden]                 f32  (rows 0/1/2 = b1/b2/b3, padded)
    # o_ref : [B_BLK, a_pad]              f32  (lane-dense)
    a_pad = o_ref.shape[1]

    x = s_ref[...]
    w1 = w_ref[0:s_pad, :]
    w2 = w_ref[s_pad:s_pad + hidden, :]
    # Only the first a_pad output lanes of W3 are meaningful.
    w3 = w_ref[s_pad + hidden:s_pad + 2 * hidden, :a_pad]
    b1 = b_ref[0:1, :]
    b2 = b_ref[1:2, :]
    b3 = b_ref[2:3, :a_pad]

    # Layer 1: bf16 MXU inputs, f32 accumulate, f32 elementwise.
    a = jnp.dot(x.astype(jnp.bfloat16), w1,
                preferred_element_type=jnp.float32) + b1
    a = jnp.maximum(a, 0.0)
    # Layer 2.
    a = jnp.dot(a.astype(jnp.bfloat16), w2,
                preferred_element_type=jnp.float32) + b2
    a = jnp.maximum(a, 0.0)
    # Layer 3 (a_pad lanes only; padded columns of W3/b3 are zero).
    a = jnp.dot(a.astype(jnp.bfloat16), w3,
                preferred_element_type=jnp.float32) + b3
    o_ref[...] = (max_action * jnp.tanh(a)).astype(o_ref.dtype)


def init_actor_params(key, state_dim, action_dim, hidden=HIDDEN):
    """Mimics PyTorch nn.Linear default init (U[-1/sqrt(fan_in), +...])."""
    keys = jax.random.split(key, 6)

    def lin(kw, kb, fan_in, fan_out):
        bound = 1.0 / jnp.sqrt(jnp.float32(fan_in))
        w = jax.random.uniform(kw, (fan_in, fan_out), jnp.float32, -bound, bound)
        b = jax.random.uniform(kb, (1, fan_out), jnp.float32, -bound, bound)
        return w, b

    w1, b1 = lin(keys[0], keys[1], state_dim, hidden)
    w2, b2 = lin(keys[2], keys[3], hidden, hidden)
    w3, b3 = lin(keys[4], keys[5], hidden, action_dim)
    return {"w1": w1, "b1": b1, "w2": w2, "b2": b2, "w3": w3, "b3": b3}


def pack_actor_params(params):
    """Pack 6 tensors into one bf16 weight slab + one f32 bias slab."""
    w1, b1 = params["w1"], params["b1"]
    w2, b2 = params["w2"], params["b2"]
    w3, b3 = params["w3"], params["b3"]
    state_dim, hidden = w1.shape
    action_dim = w3.shape[1]
    assert action_dim <= hidden, "action_dim must fit in the hidden lane width"

    s_pad = _round_up(state_dim, LANE)
    w1p = jnp.zeros((s_pad, hidden), jnp.float32).at[:state_dim, :].set(w1)
    w3p = jnp.zeros((hidden, hidden), jnp.float32).at[:, :action_dim].set(w3)
    w_slab = jnp.concatenate([w1p, w2, w3p], axis=0).astype(jnp.bfloat16)

    b_slab = jnp.zeros((SUBLANE, hidden), jnp.float32)
    b_slab = b_slab.at[0, :].set(b1.reshape(-1))
    b_slab = b_slab.at[1, :].set(b2.reshape(-1))
    b_slab = b_slab.at[2, :action_dim].set(b3.reshape(-1))
    return w_slab, b_slab


def actor_forward(state, w_slab, b_slab, max_action, *, action_dim):
    """state: [B, state_dim] f32. Returns [B, action_dim] f32."""
    B, state_dim = state.shape
    hidden = w_slab.shape[1]
    s_pad = w_slab.shape[0] - 2 * hidden
    a_pad = _round_up(action_dim, LANE)
    assert a_pad <= hidden

    # Batch tiling: one full block for small/medium batches; 512-row blocks
    # otherwise (weights resident across the grid; the batch axis is
    # "parallel" so huge batches shard across v7x's two TensorCores).
    b_blk = 512 if B > 512 else _round_up(B, SUBLANE)
    b_pad = _round_up(B, b_blk)
    grid = (b_pad // b_blk,)

    state_p = jnp.zeros((b_pad, s_pad), jnp.float32).at[:B, :state_dim].set(state)

    kernel = functools.partial(_actor_kernel, max_action=float(max_action),
                               s_pad=s_pad, hidden=hidden)

    out = pl.pallas_call(
        kernel,
        out_shape=jax.ShapeDtypeStruct((b_pad, a_pad), jnp.float32),
        grid=grid,
        in_specs=[
            pl.BlockSpec((b_blk, s_pad), lambda i: (i, 0)),
            pl.BlockSpec(w_slab.shape, lambda i: (0, 0)),   # resident across grid
            pl.BlockSpec(b_slab.shape, lambda i: (0, 0)),   # resident across grid
        ],
        out_specs=pl.BlockSpec((b_blk, a_pad), lambda i: (i, 0)),
        compiler_params=pltpu.CompilerParams(
            dimension_semantics=("parallel",)),
    )(state_p, w_slab, b_slab)

    return out[:B, :action_dim]


def actor_reference(state, params, max_action):
    """Plain-JAX reference using the same bf16-weight / f32-accumulate path."""
    f32 = jnp.float32
    w1 = params["w1"].astype(jnp.bfloat16)
    w2 = params["w2"].astype(jnp.bfloat16)
    w3 = params["w3"].astype(jnp.bfloat16)
    a = jnp.dot(state.astype(jnp.bfloat16), w1,
                preferred_element_type=f32) + params["b1"]
    a = jnp.maximum(a, 0.0)
    a = jnp.dot(a.astype(jnp.bfloat16), w2,
                preferred_element_type=f32) + params["b2"]
    a = jnp.maximum(a, 0.0)
    a = jnp.dot(a.astype(jnp.bfloat16), w3,
                preferred_element_type=f32) + params["b3"]
    return max_action * jnp.tanh(a)


if __name__ == "__main__":
    key = jax.random.PRNGKey(0)
    k_param, k_state = jax.random.split(key)

    batch = 8
    state_dim = 16
    action_dim = 8
    max_action = 2.0

    params = init_actor_params(k_param, state_dim, action_dim)
    state = jax.random.normal(k_state, (batch, state_dim), jnp.float32)

    w_slab, b_slab = pack_actor_params(params)

    out = actor_forward(state, w_slab, b_slab, max_action, action_dim=action_dim)
    out = jax.block_until_ready(out)

    ref = actor_reference(state, params, max_action)
    assert out.shape == (batch, action_dim)
    assert jnp.allclose(out, ref, atol=2e-3, rtol=2e-3), "mismatch vs reference"

    print("KERNEL_OK")
</pallas_src>

<mosaic_0001>
module attributes {stable_mosaic.version = 11 : i64} {
  func.func @_actor_kernel(%arg0: i32, %arg1: memref<8x128xf32, #tpu.memory_space<vmem>>, %arg2: memref<640x256xbf16, #tpu.memory_space<vmem>>, %arg3: memref<8x256xf32, #tpu.memory_space<vmem>>, %arg4: memref<8x128xf32, #tpu.memory_space<vmem>>) attributes {dimension_semantics = [#tpu.dimension_semantics<parallel>], iteration_bounds = array<i64: 1>, scalar_prefetch = 0 : i64, scratch_operands = 0 : i64, tpu.core_type = #tpu.core_type<tc>, window_params = [{transform_indices = @transform_0, window_bounds = array<i64: 8, 128>}, {pipeline_mode = #tpu.pipeline_mode<synchronous>, transform_indices = @transform_1, window_bounds = array<i64: 640, 256>}, {pipeline_mode = #tpu.pipeline_mode<synchronous>, transform_indices = @transform_2, window_bounds = array<i64: 8, 256>}, {transform_indices = @transform_3, window_bounds = array<i64: 8, 128>}]} {
    %c0 = arith.constant 0 : index
    %c0_0 = arith.constant 0 : index
    %0 = vector.load %arg1[%c0, %c0_0] : memref<8x128xf32, #tpu.memory_space<vmem>>, vector<8x128xf32>
    %c0_1 = arith.constant 0 : index
    %c0_2 = arith.constant 0 : index
    %1 = vector.load %arg2[%c0_1, %c0_2] : memref<640x256xbf16, #tpu.memory_space<vmem>>, vector<128x256xbf16>
    %c128 = arith.constant 128 : index
    %c0_3 = arith.constant 0 : index
    %2 = vector.load %arg2[%c128, %c0_3] : memref<640x256xbf16, #tpu.memory_space<vmem>>, vector<256x256xbf16>
    %c384 = arith.constant 384 : index
    %c0_4 = arith.constant 0 : index
    %3 = vector.load %arg2[%c384, %c0_4] : memref<640x256xbf16, #tpu.memory_space<vmem>>, vector<256x128xbf16>
    %c0_5 = arith.constant 0 : index
    %c0_6 = arith.constant 0 : index
    %4 = vector.load %arg3[%c0_5, %c0_6] : memref<8x256xf32, #tpu.memory_space<vmem>>, vector<1x256xf32>
    %c1 = arith.constant 1 : index
    %c0_7 = arith.constant 0 : index
    %5 = vector.load %arg3[%c1, %c0_7] : memref<8x256xf32, #tpu.memory_space<vmem>>, vector<1x256xf32>
    %c2 = arith.constant 2 : index
    %c0_8 = arith.constant 0 : index
    %6 = vector.load %arg3[%c2, %c0_8] : memref<8x256xf32, #tpu.memory_space<vmem>>, vector<1x128xf32>
    %7 = arith.truncf %0 : vector<8x128xf32> to vector<8x128xbf16>
    %cst = arith.constant dense<0.000000e+00> : vector<8x256xf32>
    %8 = tpu.matmul %7, %1, %cst {dimension_numbers = #tpu.dot_dimension_numbers<[1], [0], [0], [1], [0, 0, 1, 1], [], []>} : vector<8x128xbf16>, vector<128x256xbf16>, vector<8x256xf32> -> vector<8x256xf32>
    %9 = vector.broadcast %4 : vector<1x256xf32> to vector<8x256xf32>
    %10 = arith.addf %8, %9 : vector<8x256xf32>
    %cst_9 = arith.constant 0.000000e+00 : f32
    %11 = vector.broadcast %cst_9 : f32 to vector<8x256xf32>
    %12 = arith.maximumf %10, %11 : vector<8x256xf32>
    %13 = arith.truncf %12 : vector<8x256xf32> to vector<8x256xbf16>
    %cst_10 = arith.constant dense<0.000000e+00> : vector<8x256xf32>
    %14 = tpu.matmul %13, %2, %cst_10 {dimension_numbers = #tpu.dot_dimension_numbers<[1], [0], [0], [1], [0, 0, 1, 1], [], []>} : vector<8x256xbf16>, vector<256x256xbf16>, vector<8x256xf32> -> vector<8x256xf32>
    %15 = vector.broadcast %5 : vector<1x256xf32> to vector<8x256xf32>
    %16 = arith.addf %14, %15 : vector<8x256xf32>
    %cst_11 = arith.constant 0.000000e+00 : f32
    %17 = vector.broadcast %cst_11 : f32 to vector<8x256xf32>
    %18 = arith.maximumf %16, %17 : vector<8x256xf32>
    %19 = arith.truncf %18 : vector<8x256xf32> to vector<8x256xbf16>
    %cst_12 = arith.constant dense<0.000000e+00> : vector<8x128xf32>
    %20 = tpu.matmul %19, %3, %cst_12 {dimension_numbers = #tpu.dot_dimension_numbers<[1], [0], [0], [1], [0, 0, 1, 1], [], []>} : vector<8x256xbf16>, vector<256x128xbf16>, vector<8x128xf32> -> vector<8x128xf32>
    %21 = vector.broadcast %6 : vector<1x128xf32> to vector<8x128xf32>
    %22 = arith.addf %20, %21 : vector<8x128xf32>
    %23 = math.tanh %22 : vector<8x128xf32>
    %cst_13 = arith.constant 2.000000e+00 : f32
    %24 = vector.broadcast %cst_13 : f32 to vector<8x128xf32>
    %25 = arith.mulf %24, %23 : vector<8x128xf32>
    %c0_14 = arith.constant 0 : index
    %c0_15 = arith.constant 0 : index
    %26 = vector.load %arg4[%c0_14, %c0_15] : memref<8x128xf32, #tpu.memory_space<vmem>>, vector<8x128xf32>
    tpu.vector_store %arg4[%c0_14, %c0_15], %25 {strides = array<i32>} : memref<8x128xf32, #tpu.memory_space<vmem>>, vector<8x128xf32>,
    return
  }
  func.func @transform_0(%arg0: i32) -> (i32, i32) {
    %c0_i32 = arith.constant 0 : i32
    %c0_i32_0 = arith.constant 0 : i32
    return %arg0, %c0_i32 : i32, i32
  }
  func.func @transform_1(%arg0: i32) -> (i32, i32) {
    %c0_i32 = arith.constant 0 : i32
    %c0_i32_0 = arith.constant 0 : i32
    %c0_i32_1 = arith.constant 0 : i32
    return %c0_i32, %c0_i32_0 : i32, i32
  }
  func.func @transform_2(%arg0: i32) -> (i32, i32) {
    %c0_i32 = arith.constant 0 : i32
    %c0_i32_0 = arith.constant 0 : i32
    %c0_i32_1 = arith.constant 0 : i32
    return %c0_i32, %c0_i32_0 : i32, i32
  }
  func.func @transform_3(%arg0: i32) -> (i32, i32) {
    %c0_i32 = arith.constant 0 : i32
    %c0_i32_0 = arith.constant 0 : i32
    return %arg0, %c0_i32 : i32, i32
  }
}

</mosaic_0001>

<bundles_post_ra>
// kernel: tpu_custom_call.1
= control target key start
LH: loop header
LB: loop body
LE: loop exit
PB: predicated region body
PF: predicated region fallthrough
CT: control target
= control target key end

     0   :  { %8 = vsyncpa [#allocation3], 0  ;;  %s954_s0 = inlined_call_operand.hbm [shape: f32[8,128], index: 0, kind: input, shape index: {}]   ;;  %s955_s1 = inlined_call_operand.hbm [shape: bf16[640,256], index: 1, kind: input, shape index: {}]   ;;  %s956_s2 = inlined_call_operand.hbm [shape: f32[8,256], index: 2, kind: input, shape index: {}]   ;;  %s957_s3 = inlined_call_operand.hbm [shape: f32[8,128], index: 3, kind: output, shape index: {}]  }
   0x1   :  { %9 = vsyncpa [#allocation6], 0 }
   0x2   :  { %10 = vsyncpa [#allocation4], 0  ;;  %s915_s12 = smov [#allocation5]  }
   0x3   :  { %s26_s13 = sshll.u32 %s915_s12, 4  ;;  %s27_s13 = int_to_ptr.vmem [resolvable:$true] %s26_s13 }
   0x4   :  { %s837_s14 = scalar_lea.vmem %s27_s13, 10240  ;;  %p842_p1 = scmp.lt.s32.totalorder %s27_s13, %s27_s13 }
   0x5   :  { %p838_p0 = scmp.ne.s32.totalorder %s27_s13, %s837_s14  ;;  %p843_p2 = scmp.lt.s32.totalorder %s837_s14, %s837_s14 }
   0x7   :  { %p844_p3 = por %p843_p2, %p842_p1 }
   0x9   :  { %p845_p4 = pnand %p844_p3, %p838_p0 }
   0xb   :  { %848 = shalt.err (!%p845_p4)
}
   0xc   :  { %s916_s15 = smov 128   ;;  %s917_s16 = smov 8  }
   0xd   :  { %32 = dma.hbm_to_vmem [thread:$0]  %s955_s1, 10240, %s27_s13, [#allocation6], %s916_s15, %s916_s15, %s917_s16  }
   0xe   :  { %s918_s19 = smov [#allocation2]   ;;  %s919_s21 = smov [#allocation7]  }
   0xf   :  { %s17_s20 = sshll.u32 %s918_s19, 4  ;;  %s39_s22 = sshll.u32 %s919_s21, 4  ;;  %s18_s20 = int_to_ptr.vmem [resolvable:$true] %s17_s20  ;;  %s40_s22 = int_to_ptr.vmem [resolvable:$true] %s39_s22 }
  0x10   :  { %s857_s23 = scalar_lea.vmem %s18_s20, 128  ;;  %p862_p6 = scmp.lt.s32.totalorder %s18_s20, %s18_s20 }
  0x11   :  { %p858_p5 = scmp.ne.s32.totalorder %s18_s20, %s857_s23  ;;  %p863_p7 = scmp.lt.s32.totalorder %s857_s23, %s857_s23 }
  0x13   :  { %p864_p8 = por %p863_p7, %p862_p6 }
  0x15   :  { %p865_p9 = pnand %p864_p8, %p858_p5 }
  0x17   :  { %868 = shalt.err (!%p865_p9)
}
  0x18   :  { %20 = dma.hbm_to_vmem [thread:$0]  %s954_s0, 128, %s18_s20, [#allocation3]  }
  0x19   :  { %s877_s26 = scalar_lea.vmem %s40_s22, 256  ;;  %p882_p11 = scmp.lt.s32.totalorder %s40_s22, %s40_s22 }
  0x1a   :  { %p878_p10 = scmp.ne.s32.totalorder %s40_s22, %s877_s26  ;;  %p883_p12 = scmp.lt.s32.totalorder %s877_s26, %s877_s26 }
  0x1c   :  { %p884_p13 = por %p883_p12, %p882_p11 }
  0x1e   :  { %p885_p0 = pnand %p884_p13, %p878_p10 }
  0x20   :  { %888 = shalt.err (!%p885_p0)
}
  0x21   :  { %42 = dma.hbm_to_vmem [thread:$0]  %s956_s2, 256, %s40_s22, [#allocation6]  }
  0x22   :  { %909 = dma.done.wait [#allocation3], 128  }
  0x23   :  { %910 = vsyncadd [#allocation3], 4294967168 }
  0x24   :  { %911 = dma.done.wait [#allocation6], 10496  }
  0x25   :  { %912 = vsyncadd [#allocation6], 4294956800  ;;  %v920_v0 = vmov 0   ;;  %v739_v1 = vld [vmem:[#allocation5 + $0x74] ss:$8 sps:$4 sm:$0xff]   ;;  %v140_v63 = vlaneseq  ;;  %s921_s0 = smov [#allocation8]  }
  0x26   :  { %262 = vmatprep.mubr.bf16.mxu0 %v920_v0  ;;  %v741_v2 = vld [vmem:[#allocation5 + $0x70] ss:$8 sps:$4 sm:$0xff]   ;;  %230 = vmatprep.subr.bf16.mxu0 %v739_v1  ;;  %v742_v3 = vld [vmem:[#allocation5 + $0x64] ss:$8 sps:$4 sm:$0xff]   ;;  %v744_v4 = vld [vmem:[#allocation5 + $0x60] ss:$8 sps:$4 sm:$0xff]  }
  0x27   :  { %231 = vmatpush1.bf16.msra.mxu0 %v741_v2  ;;  %v745_v5 = vld [vmem:[#allocation5 + $0x54] ss:$8 sps:$4 sm:$0xff]   ;;  %v747_v6 = vld [vmem:[#allocation5 + $0x50] ss:$8 sps:$4 sm:$0xff]   ;;  %v748_v7 = vld [vmem:[#allocation5 + $0x44] ss:$8 sps:$4 sm:$0xff]  }
  0x28   :  { %232 = vmatprep.subr.bf16.mxu0 %v742_v3  ;;  %v750_v8 = vld [vmem:[#allocation5 + $0x40] ss:$8 sps:$4 sm:$0xff]   ;;  %v751_v9 = vld [vmem:[#allocation5 + $0x34] ss:$8 sps:$4 sm:$0xff]   ;;  %v765_v11 = vld [vmem:[#allocation5 + $0xf0] ss:$8 sps:$4 sm:$0xff]  }
  0x29   :  { %v763_v10 = vld [vmem:[#allocation5 + $0xf4] ss:$8 sps:$4 sm:$0xff]   ;;  %v766_v12 = vld [vmem:[#allocation5 + $0xe4] ss:$8 sps:$4 sm:$0xff]   ;;  %v753_v13 = vld [vmem:[#allocation5 + $0x30] ss:$8 sps:$4 sm:$0xff]  }
  0x2a   :  { %446 = vmatprep.subr.bf16.mxu1 %v763_v10  ;;  %v768_v14 = vld [vmem:[#allocation5 + $0xe0] ss:$8 sps:$4 sm:$0xff]   ;;  %v769_v15 = vld [vmem:[#allocation5 + $0xd4] ss:$8 sps:$4 sm:$0xff]   ;;  %v754_v16 = vld [vmem:[#allocation5 + $0x24] ss:$8 sps:$4 sm:$0xff]  }
  0x2b   :  { %233 = vmatpush1.bf16.msra.mxu0 %v744_v4  ;;  %447 = vmatpush1.bf16.msra.mxu1 %v765_v11  ;;  %v756_v17 = vld [vmem:[#allocation5 + $0x20] ss:$8 sps:$4 sm:$0xff]   ;;  %v771_v18 = vld [vmem:[#allocation5 + $0xd0] ss:$8 sps:$4 sm:$0xff]   ;;  %v772_v19 = vld [vmem:[#allocation5 + $0xc4] ss:$8 sps:$4 sm:$0xff]  }
  0x2c   :  { %234 = vmatprep.subr.bf16.mxu0 %v745_v5  ;;  %448 = vmatprep.subr.bf16.mxu1 %v766_v12  ;;  %v757_v20 = vld [vmem:[#allocation5 + $0x14] ss:$8 sps:$4 sm:$0xff]   ;;  %v759_v21 = vld [vmem:[#allocation5 + $0x10] ss:$8 sps:$4 sm:$0xff]   ;;  %v774_v22 = vld [vmem:[#allocation5 + $0xc0] ss:$8 sps:$4 sm:$0xff]  }
  0x2d   :  { %v775_v23 = vld [vmem:[#allocation5 + $0xb4] ss:$8 sps:$4 sm:$0xff]   ;;  %v760_v24 = vld [vmem:[#allocation5 + $0x4] ss:$8 sps:$4 sm:$0xff]   ;;  %v762_v25 = vld [vmem:[#allocation5] ss:$8 sps:$4 sm:$0xff]  }
  0x2e   :  { %v53_v26 = vld [vmem:[#allocation2] sm:$0xff]  ;;  %v778_v28 = vld [vmem:[#allocation5 + $0xa4] ss:$8 sps:$4 sm:$0xff]   ;;  %v780_v29 = vld [vmem:[#allocation5 + $0xa0] ss:$8 sps:$4 sm:$0xff]   ;;  %v141_v0 = vshrl.u32 %v140_v63, 7 }
  0x2f   :  { %235 = vmatpush1.bf16.msra.mxu0 %v747_v6  ;;  %449 = vmatpush1.bf16.msra.mxu1 %v768_v14  ;;  %v777_v27 = vld [vmem:[#allocation5 + $0xb0] ss:$8 sps:$4 sm:$0xff]   ;;  %v138_v30 = vpack.c.bf16 %v53_v26, %v53_v26  ;;  %v781_v31 = vld [vmem:[#allocation5 + $0x94] ss:$8 sps:$4 sm:$0xff]   ;;  %v784_v33 = vld [vmem:[#allocation5 + $0x84] ss:$8 sps:$4 sm:$0xff]  }
  0x30   :  { %236 = vmatprep.subr.bf16.mxu0 %v748_v7  ;;  %450 = vmatprep.subr.bf16.mxu1 %v769_v15  ;;  %v783_v32 = vld [vmem:[#allocation5 + $0x90] ss:$8 sps:$4 sm:$0xff]   ;;  %v786_v34 = vld [vmem:[#allocation5 + $0x80] ss:$8 sps:$4 sm:$0xff]   ;;  %v787_v35 = vld [vmem:[#allocation5 + $0x174] ss:$8 sps:$4 sm:$0xff]  }
  0x31   :  { %v789_v36 = vld [vmem:[#allocation5 + $0x170] ss:$8 sps:$4 sm:$0xff]   ;;  %v790_v37 = vld [vmem:[#allocation5 + $0x164] ss:$8 sps:$4 sm:$0xff]   ;;  %v792_v38 = vld [vmem:[#allocation5 + $0x160] ss:$8 sps:$4 sm:$0xff]  }
  0x32   :  { %v793_v39 = vld [vmem:[#allocation5 + $0x154] ss:$8 sps:$4 sm:$0xff]   ;;  %v795_v40 = vld [vmem:[#allocation5 + $0x150] ss:$8 sps:$4 sm:$0xff]   ;;  %v796_v41 = vld [vmem:[#allocation5 + $0x144] ss:$8 sps:$4 sm:$0xff]  }
  0x33   :  { %237 = vmatpush1.bf16.msra.mxu0 %v750_v8  ;;  %451 = vmatpush1.bf16.msra.mxu1 %v771_v18  ;;  %v798_v42 = vld [vmem:[#allocation5 + $0x140] ss:$8 sps:$4 sm:$0xff]   ;;  %v799_v43 = vld [vmem:[#allocation5 + $0x134] ss:$8 sps:$4 sm:$0xff]   ;;  %v801_v44 = vld [vmem:[#allocation5 + $0x130] ss:$8 sps:$4 sm:$0xff]  }
  0x34   :  { %238 = vmatprep.subr.bf16.mxu0 %v751_v9  ;;  %452 = vmatprep.subr.bf16.mxu1 %v772_v19  ;;  %v802_v45 = vld [vmem:[#allocation5 + $0x124] ss:$8 sps:$4 sm:$0xff]   ;;  %v804_v46 = vld [vmem:[#allocation5 + $0x120] ss:$8 sps:$4 sm:$0xff]   ;;  %v805_v47 = vld [vmem:[#allocation5 + $0x114] ss:$8 sps:$4 sm:$0xff]  }
  0x35   :  { %v807_v48 = vld [vmem:[#allocation5 + $0x110] ss:$8 sps:$4 sm:$0xff]   ;;  %v808_v49 = vld [vmem:[#allocation5 + $0x104] ss:$8 sps:$4 sm:$0xff]   ;;  %v810_v50 = vld [vmem:[#allocation5 + $0x100] ss:$8 sps:$4 sm:$0xff]  }
  0x36   :  { %v811_v51 = vld [vmem:[#allocation5 + $0x270] ss:$8 sps:$4 sm:$0xff]   ;;  %v813_v53 = vld [vmem:[#allocation5 + $0x260] ss:$8 sps:$4 sm:$0xff]   ;;  %v142_v1 = vsub.s32 0, %v141_v0  ;;  %v146_v3 = vsub.s32 1, %v141_v0 }
  0x37   :  { %239 = vmatpush1.bf16.msra.mxu0 %v753_v13  ;;  %453 = vmatpush1.bf16.msra.mxu1 %v774_v22  ;;  %v812_v52 = vld [vmem:[#allocation5 + $0x1f0] ss:$8 sps:$4 sm:$0xff]   ;;  %v814_v54 = vld [vmem:[#allocation5 + $0x1e0] ss:$8 sps:$4 sm:$0xff]   ;;  %s636_s2 = sshll.u32 %s921_s0, 4  ;;  %s637_s2 = int_to_ptr.vmem [resolvable:$true] %s636_s2 }
  0x38   :  { %240 = vmatprep.subr.bf16.mxu0 %v754_v16  ;;  %454 = vmatprep.subr.bf16.mxu1 %v775_v23  ;;  %v815_v55 = vld [vmem:[#allocation5 + $0x250] ss:$8 sps:$4 sm:$0xff]   ;;  %v817_v57 = vld [vmem:[#allocation5 + $0x240] ss:$8 sps:$4 sm:$0xff]   ;;  %s889_s28 = scalar_lea.vmem %s637_s2, 128  ;;  %p894_p2 = scmp.lt.s32.totalorder %s637_s2, %s637_s2 }
  0x39   :  { %v816_v56 = vld [vmem:[#allocation5 + $0x1d0] ss:$8 sps:$4 sm:$0xff]   ;;  %v818_v58 = vld [vmem:[#allocation5 + $0x1c0] ss:$8 sps:$4 sm:$0xff]   ;;  %p890_p1 = scmp.ne.s32.totalorder %s637_s2, %s889_s28  ;;  %p895_p3 = scmp.lt.s32.totalorder %s889_s28, %s889_s28 }
  0x3a   :  { %v819_v59 = vld [vmem:[#allocation5 + $0x230] ss:$8 sps:$4 sm:$0xff]   ;;  %v821_v61 = vld [vmem:[#allocation5 + $0x220] ss:$8 sps:$4 sm:$0xff]  }
  0x3b   :  { %241 = vmatpush1.bf16.msra.mxu0 %v756_v17  ;;  %455 = vmatpush1.bf16.msra.mxu1 %v777_v27  ;;  %v820_v60 = vld [vmem:[#allocation5 + $0x1b0] ss:$8 sps:$4 sm:$0xff]   ;;  %v822_v62 = vld [vmem:[#allocation5 + $0x1a0] ss:$8 sps:$4 sm:$0xff]   ;;  %p896_p4 = por %p895_p3, %p894_p2 }
  0x3c   :  { %242 = vmatprep.subr.bf16.mxu0 %v757_v20  ;;  %456 = vmatprep.subr.bf16.mxu1 %v778_v28  ;;  %v134_v2 = vld [vmem:[#allocation7] ss:$8 sm:$0x3]  ;;  %v823_v16 = vld [vmem:[#allocation5 + $0x210] ss:$8 sps:$4 sm:$0xff]  }
  0x3d   :  { %v143_v4 = vrot.slane %v134_v2, %v142_v1  ;;  %v147_v5 = vrot.slane %v134_v2, %v146_v3  ;;  %v824_v17 = vld [vmem:[#allocation5 + $0x190] ss:$8 sps:$4 sm:$0xff]   ;;  %v825_v18 = vld [vmem:[#allocation5 + $0x200] ss:$8 sps:$4 sm:$0xff]   ;;  %p897_p5 = pnand %p896_p4, %p890_p1 }
  0x3e   :  { %v826_v19 = vld [vmem:[#allocation5 + $0x180] ss:$8 sps:$4 sm:$0xff]  }
  0x3f   :  { %243 = vmatpush1.bf16.msra.mxu0 %v759_v21  ;;  %457 = vmatpush1.bf16.msra.mxu1 %v780_v29  ;;  %v136_v20 = vld [vmem:[#allocation7 + $0x1] ss:$8 sm:$0x3] }
  0x40   :  { %244 = vmatprep.subr.bf16.mxu0 %v760_v24  ;;  %458 = vmatprep.subr.bf16.mxu1 %v781_v31  ;;  %v279_v21 = vrot.slane %v136_v20, %v142_v1  ;;  %v283_v22 = vrot.slane %v136_v20, %v146_v3 }
  0x43   :  { %245 = vmatpush1.bf16.msra.mxu0 %v762_v25  ;;  %459 = vmatpush1.bf16.msra.mxu1 %v783_v32 }
  0x44   :  { %460 = vmatprep.subr.bf16.mxu1 %v784_v33  ;;  %710 = vmatprep.subr.bf16.mxu0 %v811_v51 }
  0x46   :  { %263 = vmatmul.mubr.bf16.vlgmr.msra.gmra.mxu0 %v138_v30 }
  0x47   :  { %461 = vmatpush1.bf16.msra.mxu1 %v786_v34  ;;  %711 = vmatpush3.bf16.msra.mxu0 %v812_v52  ;;  %v137_v34 = vld [vmem:[#allocation7 + $0x2] ss:$0 sm:$0xff] }
  0x48   :  { %462 = vmatprep.subr.bf16.mxu1 %v787_v35  ;;  %712 = vmatprep.subr.bf16.mxu0 %v813_v53 }
  0x4b   :  { %463 = vmatpush2.bf16.msra.mxu1 %v789_v36  ;;  %713 = vmatpush3.bf16.msra.mxu0 %v814_v54 }
  0x4c   :  { %464 = vmatprep.subr.bf16.mxu1 %v790_v37  ;;  %714 = vmatprep.subr.bf16.mxu0 %v815_v55 }
  0x4f   :  { %465 = vmatpush2.bf16.msra.mxu1 %v792_v38  ;;  %715 = vmatpush3.bf16.msra.mxu0 %v816_v56 }
  0x50   :  { %466 = vmatprep.subr.bf16.mxu1 %v793_v39  ;;  %716 = vmatprep.subr.bf16.mxu0 %v817_v57 }
  0x53   :  { %467 = vmatpush2.bf16.msra.mxu1 %v795_v40  ;;  %717 = vmatpush3.bf16.msra.mxu0 %v818_v58 }
  0x54   :  { %468 = vmatprep.subr.bf16.mxu1 %v796_v41  ;;  %718 = vmatprep.subr.bf16.mxu0 %v819_v59 }
  0x57   :  { %469 = vmatpush2.bf16.msra.mxu1 %v798_v42  ;;  %719 = vmatpush3.bf16.msra.mxu0 %v820_v60 }
  0x58   :  { %470 = vmatprep.subr.bf16.mxu1 %v799_v43  ;;  %720 = vmatprep.subr.bf16.mxu0 %v821_v61 }
  0x5b   :  { %471 = vmatpush2.bf16.msra.mxu1 %v801_v44  ;;  %721 = vmatpush3.bf16.msra.mxu0 %v822_v62 }
  0x5c   :  { %472 = vmatprep.subr.bf16.mxu1 %v802_v45  ;;  %722 = vmatprep.subr.bf16.mxu0 %v823_v16 }
  0x5f   :  { %473 = vmatpush2.bf16.msra.mxu1 %v804_v46  ;;  %723 = vmatpush3.bf16.msra.mxu0 %v824_v17 }
  0x60   :  { %474 = vmatprep.subr.bf16.mxu1 %v805_v47  ;;  %724 = vmatprep.subr.bf16.mxu0 %v825_v18 }
  0x63   :  { %475 = vmatpush2.bf16.msra.mxu1 %v807_v48  ;;  %725 = vmatpush3.bf16.msra.mxu0 %v826_v19 }
  0x64   :  { %476 = vmatprep.subr.bf16.mxu1 %v808_v49 }
  0x67   :  { %477 = vmatpush2.bf16.msra.mxu1 %v810_v50 }
 0x106   :  { %v264_v6 = vpop.f32.mrf.mxu0 }
 0x107   :  { %v265_v7 = vadd.f32 %v264_v6, %v143_v4 }
 0x108   :  { %v266_v8 = vpop.f32.mrf.mxu0 }
 0x109   :  { %v267_v9 = vadd.f32 %v266_v8, %v147_v5  ;;  %v271_v10 = vmax.f32 %v265_v7, 0.0 }
 0x10a   :  { %v268_v11 = vpop.f32.mrf.mxu0 }
 0x10b   :  { %v272_v12 = vmax.f32 %v267_v9, 0.0  ;;  %v273_v15 = vpack.c.bf16 %v271_v10, %v271_v10 }
 0x10c   :  { %v269_v13 = vpop.f32.mrf.mxu0 }
 0x10d   :  { %v274_v14 = vpack.c.bf16 %v272_v12, %v272_v12 }
 0x10f   :  { %478 = vmatprep.mubr.bf16.mxu1 %v274_v14 }
 0x110   :  { %479 = vmatmul.mubr.bf16.vlgmr.msra.gmra.mxu1 %v273_v15 }
 0x1d0   :  { %v480_v23 = vpop.f32.mrf.mxu1 }
 0x1d1   :  { %v481_v24 = vadd.f32 %v480_v23, %v279_v21 }
 0x1d2   :  { %v482_v25 = vpop.f32.mrf.mxu1 }
 0x1d3   :  { %v483_v26 = vadd.f32 %v482_v25, %v283_v22  ;;  %v487_v27 = vmax.f32 %v481_v24, 0.0 }
 0x1d4   :  { %v484_v28 = vpop.f32.mrf.mxu1 }
 0x1d5   :  { %v488_v29 = vmax.f32 %v483_v26, 0.0  ;;  %v489_v32 = vpack.c.bf16 %v487_v27, %v487_v27 }
 0x1d6   :  { %v485_v30 = vpop.f32.mrf.mxu1 }
 0x1d7   :  { %v490_v31 = vpack.c.bf16 %v488_v29, %v488_v29 }
 0x1d9   :  { %619 = vmatprep.mubr.bf16.mxu0 %v490_v31 }
 0x1da   :  { %620 = vmatmul.mubr.bf16.vlgmr.msra.gmra.mxu0 %v489_v32 }
 0x29a   :  { %v726_v33 = vpop.f32.mrf.mxu0 }
 0x29c   :  { %v727_v35 = vpop.f32.mrf.mxu0 }
 0x29d   :  { %v728_v36 = vadd.f32 %v727_v35, %v726_v33 }
 0x29e   :  { %v729_v37 = vpop.f32.mrf.mxu0 }
 0x29f   :  { %v622_v38 = vadd.f32 %v728_v36, %v137_v34 }
 0x2a0   :  { %v730_v39 = vpop.f32.mrf.mxu0 }
 0x2a1   :  { %827 = vtanh.f32 %v622_v38 }
 0x2ae   :  { %v828_v40 = vpop.eup %827 }
 0x2af   :  { %v628_v41 = vmul.f32 2.0, %v828_v40 }
 0x2b1   :  { %629 = vst [vmem:[#allocation8] sm:$0xff] %v628_v41 }
 0x2b2   :  { %900 = shalt.err (!%p897_p5)
}
 0x2b3   :  { %639 = dma.vmem_to_hbm [thread:$0]  %s637_s2, 128, %s957_s3, [#allocation4]  }
 0x2b4   :  { %913 = dma.done.wait [#allocation4], 128  }
 0x2b5   :  { %914 = vsyncadd [#allocation4], 4294967168 }
 0x2b6   :  { %643 = vsyncpa [#allocation3], 1 }
 0x2b7   :  { %644 = vsyncpa [#allocation6], 1 }
 0x2b8   :  { %645 = vsyncpa [#allocation4], 1 }

</bundles_post_ra>
